<compile_context>
chip_gen: v7x
topology: tpu7x:2x2x1
jax: 0.10.0
libtpu: 0.0.40
codegen_flags: <defaults>
</compile_context>

<pallas_src>
import numpy as np
import jax
import jax.numpy as jnp
from jax.experimental import pallas as pl
from jax.experimental.pallas import tpu as pltpu


# -----------------------------------------------------------------------------
# Buffer construction (mirrors PositionalEncoding.__init__).
# -----------------------------------------------------------------------------
def make_pe_table(model_dim: int, max_len: int = 100) -> jnp.ndarray:
    position = np.arange(0, max_len, dtype=np.float32)[:, None]            # (L, 1)
    div_term = np.exp(np.arange(0, model_dim, 2, dtype=np.float32)
                      * -(np.log(10000.0) / model_dim))                    # (D/2,)
    pe = np.zeros((max_len, model_dim), dtype=np.float32)
    pe[:, 0::2] = np.sin(position * div_term)
    pe[:, 1::2] = np.cos(position * div_term)
    return jnp.asarray(pe)                                                 # (L, D)


# -----------------------------------------------------------------------------
# Kernel body (shared by all paths): pure VPU elementwise add.
# pe stays f32 (no double rounding for bf16 x); compute in f32 so bf16 I/O also
# lowers cleanly on v5e (no bf16 VALU). For f32 inputs the casts are no-ops.
# -----------------------------------------------------------------------------
def _add_pe_kernel(x_ref, pe_ref, o_ref):
    o_ref[...] = (x_ref[...].astype(jnp.float32)
                  + pe_ref[...].astype(jnp.float32)).astype(o_ref.dtype)


def _sublane_pack(dtype) -> int:
    """Packed sublane count per vreg row: 8 for f32, 16 for bf16, 32 for int8/fp8."""
    return max(8, 32 // jnp.dtype(dtype).itemsize)


# -----------------------------------------------------------------------------
# Small-problem path: single lane-dense 2D block, grid=().
# -----------------------------------------------------------------------------
def _forward_flat(x2: jnp.ndarray, pe2: jnp.ndarray) -> jnp.ndarray:
    B, F = x2.shape
    return pl.pallas_call(
        _add_pe_kernel,
        out_shape=jax.ShapeDtypeStruct((B, F), x2.dtype),
        input_output_aliases={0: 0},          # x fully overwritten
    )(x2, pe2)


# -----------------------------------------------------------------------------
# Main tiled path: flattened (B, S*D), batch-tiled blocks, pe fetched once.
# -----------------------------------------------------------------------------
def _forward_batch_tiled(x2: jnp.ndarray, pe2: jnp.ndarray, *,
                         target_block_bytes: int,
                         vmem_limit_bytes: int) -> jnp.ndarray:
    B, F = x2.shape
    itemsize = jnp.dtype(x2.dtype).itemsize
    pack = _sublane_pack(x2.dtype)

    bb = max(1, target_block_bytes // max(1, F * itemsize))
    bb = max(pack, (bb // pack) * pack)        # multiple of the packed sublane count
    if bb >= B:
        bb = B                                 # full dim satisfies the (8,128) rule

    x_bytes = B * F * itemsize
    cost = pl.CostEstimate(flops=B * F, transcendentals=0,
                           bytes_accessed=int(2 * x_bytes + F * 4))

    return pl.pallas_call(
        _add_pe_kernel,
        out_shape=jax.ShapeDtypeStruct((B, F), x2.dtype),
        grid=(pl.cdiv(B, bb),),                # ragged final batch tile handled by Pallas
        in_specs=[
            pl.BlockSpec((bb, F), lambda i: (i, 0)),   # x tile (lane-dense last dim)
            pl.BlockSpec((1, F), lambda i: (0, 0)),    # pe: constant block -> DMA'd once
        ],
        out_specs=pl.BlockSpec((bb, F), lambda i: (i, 0)),
        input_output_aliases={0: 0},
        compiler_params=pltpu.CompilerParams(
            dimension_semantics=("parallel",),         # megacore / dual-TC sharding
            vmem_limit_bytes=vmem_limit_bytes,         # <= ~56 MiB keeps v7x safe
        ),
        cost_estimate=cost,
    )(x2, pe2)


# -----------------------------------------------------------------------------
# Fallback for unusually huge rows: 3D seq-tiled, batch innermost so the pe
# block index is constant across the inner batch loop (DMA skipped).
# -----------------------------------------------------------------------------
def _forward_seq_tiled(x: jnp.ndarray, pe3: jnp.ndarray, *,
                       target_block_bytes: int,
                       vmem_limit_bytes: int,
                       seq_tile: int | None = None) -> jnp.ndarray:
    B, S, D = x.shape
    itemsize = jnp.dtype(x.dtype).itemsize
    pack = _sublane_pack(x.dtype)

    if seq_tile is not None:
        ts = seq_tile
    else:
        ts = max(1, target_block_bytes // max(1, D * itemsize))
        ts = max(pack, (ts // pack) * pack)
    if ts >= S:
        ts = S                                  # full dim satisfies the (8,128) rule

    x_bytes = B * S * D * itemsize
    cost = pl.CostEstimate(flops=B * S * D, transcendentals=0,
                           bytes_accessed=int(2 * x_bytes + S * D * 4))

    return pl.pallas_call(
        _add_pe_kernel,
        out_shape=jax.ShapeDtypeStruct((B, S, D), x.dtype),
        grid=(pl.cdiv(S, ts), B),               # batch innermost -> pe reused across B
        in_specs=[
            pl.BlockSpec((1, ts, D), lambda s, b: (b, s, 0)),   # x tile
            pl.BlockSpec((1, ts, D), lambda s, b: (0, s, 0)),   # pe tile (batch-shared)
        ],
        out_specs=pl.BlockSpec((1, ts, D), lambda s, b: (b, s, 0)),
        input_output_aliases={0: 0},
        compiler_params=pltpu.CompilerParams(
            dimension_semantics=("parallel", "parallel"),
            vmem_limit_bytes=vmem_limit_bytes,
        ),
        cost_estimate=cost,
    )(x, pe3)


# -----------------------------------------------------------------------------
# Public forward: dispatch on problem size.
# -----------------------------------------------------------------------------
_FLAT_PATH_MAX_BYTES = 1 * 1024 * 1024            # above this, tiled path gets pipelining / both TCs
_DEFAULT_TARGET_BLOCK_BYTES = 8 * 1024 * 1024     # ~8 MiB blocks: >= ~5 us HBM time even on v7x
_DEFAULT_VMEM_LIMIT_BYTES = 48 * 1024 * 1024      # 2x(x)+2x(out)+2x(pe) bufs, safe on 64 MiB v7x


def positional_encoding_forward(x: jnp.ndarray, pe: jnp.ndarray, *,
                                target_block_bytes: int = _DEFAULT_TARGET_BLOCK_BYTES,
                                vmem_limit_bytes: int = _DEFAULT_VMEM_LIMIT_BYTES) -> jnp.ndarray:
    """x: (B, S, D); pe: (max_len, D). Returns x + pe[:S] (same dtype as x)."""
    B, S, D = x.shape
    pe_slice = pe[:S, :].astype(jnp.float32)      # pe stays f32: tiny, no double rounding
    itemsize = jnp.dtype(x.dtype).itemsize
    row_bytes = S * D * itemsize
    total_bytes = B * row_bytes
    pack = _sublane_pack(x.dtype)

    if total_bytes <= _FLAT_PATH_MAX_BYTES:
        out2 = _forward_flat(x.reshape(B, S * D), pe_slice.reshape(1, S * D))
        return out2.reshape(B, S, D)

    if min(pack, B) * row_bytes <= target_block_bytes:
        out2 = _forward_batch_tiled(x.reshape(B, S * D), pe_slice.reshape(1, S * D),
                                    target_block_bytes=target_block_bytes,
                                    vmem_limit_bytes=vmem_limit_bytes)
        return out2.reshape(B, S, D)

    # Huge-row fallback (very large model_dim): tile the sequence axis instead.
    return _forward_seq_tiled(x, pe_slice.reshape(1, S, D),
                              target_block_bytes=target_block_bytes,
                              vmem_limit_bytes=vmem_limit_bytes)


if __name__ == "__main__":
    MAX_LEN = 100
    key = jax.random.PRNGKey(0)
    k1, k2, k3 = jax.random.split(key, 3)

    # --- demo shape from the module (flat path: single lane-dense block) ---
    B, S, D = 2, 8, 32
    x = jax.random.normal(k1, (B, S, D), dtype=jnp.float32)
    pe = make_pe_table(D, MAX_LEN)
    ref = x + pe[None, :S, :]
    out = jax.block_until_ready(positional_encoding_forward(x, pe))
    np.testing.assert_allclose(np.asarray(out), np.asarray(ref), rtol=1e-6, atol=1e-6)

    # --- batch-tiled path: forced tiny block target -> 8-row blocks, ragged
    #     final batch tile together with input_output_aliases + "parallel" ---
    B2, S2, D2 = 20, 12, 64
    x2 = jax.random.normal(k2, (B2, S2, D2), dtype=jnp.float32)
    pe2 = make_pe_table(D2, MAX_LEN)
    ref2 = x2 + pe2[None, :S2, :]
    out2 = jax.block_until_ready(
        _forward_batch_tiled(x2.reshape(B2, S2 * D2),
                             pe2[:S2].reshape(1, S2 * D2),
                             target_block_bytes=4 * 1024,
                             vmem_limit_bytes=32 * 1024 * 1024)
    ).reshape(B2, S2, D2)
    np.testing.assert_allclose(np.asarray(out2), np.asarray(ref2), rtol=1e-6, atol=1e-6)

    # --- seq-tiled fallback: forced small seq tile, batch-innermost grid
    #     (pe reuse), ragged final sequence tile ---
    B3, S3, D3 = 2, 40, 128
    x3 = jax.random.normal(k3, (B3, S3, D3), dtype=jnp.float32)
    pe3 = make_pe_table(D3, MAX_LEN)
    ref3 = x3 + pe3[None, :S3, :]
    out3 = jax.block_until_ready(
        _forward_seq_tiled(x3, pe3[:S3].reshape(1, S3, D3),
                           target_block_bytes=4 * 1024 * 1024,
                           vmem_limit_bytes=32 * 1024 * 1024,
                           seq_tile=16))
    np.testing.assert_allclose(np.asarray(out3), np.asarray(ref3), rtol=1e-6, atol=1e-6)

    print("KERNEL_OK")
</pallas_src>

<mosaic_0001>
module attributes {stable_mosaic.version = 11 : i64} {
  func.func @_add_pe_kernel(%arg0: memref<2x256xf32, #tpu.memory_space<vmem>>, %arg1: memref<1x256xf32, #tpu.memory_space<vmem>>, %arg2: memref<2x256xf32, #tpu.memory_space<vmem>>) attributes {dimension_semantics = [], scalar_prefetch = 0 : i64, scratch_operands = 0 : i64, tpu.core_type = #tpu.core_type<tc>} {
    %c0 = arith.constant 0 : index
    %c0_0 = arith.constant 0 : index
    %0 = vector.load %arg0[%c0, %c0_0] : memref<2x256xf32, #tpu.memory_space<vmem>>, vector<2x256xf32>
    %c0_1 = arith.constant 0 : index
    %c0_2 = arith.constant 0 : index
    %1 = vector.load %arg1[%c0_1, %c0_2] : memref<1x256xf32, #tpu.memory_space<vmem>>, vector<1x256xf32>
    %2 = vector.broadcast %1 : vector<1x256xf32> to vector<2x256xf32>
    %3 = arith.addf %0, %2 : vector<2x256xf32>
    %c0_3 = arith.constant 0 : index
    %c0_4 = arith.constant 0 : index
    %4 = vector.load %arg2[%c0_3, %c0_4] : memref<2x256xf32, #tpu.memory_space<vmem>>, vector<2x256xf32>
    tpu.vector_store %arg2[%c0_3, %c0_4], %3 {strides = array<i32>} : memref<2x256xf32, #tpu.memory_space<vmem>>, vector<2x256xf32>,
    return
  }
}

</mosaic_0001>

<bundles_post_ra>
// kernel: tpu_custom_call.1
= control target key start
LH: loop header
LB: loop body
LE: loop exit
PB: predicated region body
PF: predicated region fallthrough
CT: control target
= control target key end

     0   :  { %7 = vsyncpa [#allocation3], 0  ;;  %s157_s0 = inlined_call_operand.hbm [shape: f32[2,256], index: 0, kind: input, shape index: {}, may-alias: {0,2}]   ;;  %s158_s1 = inlined_call_operand.vmem [shape: f32[1,256], index: 1, kind: input, shape index: {}]   ;;  %s159_s2 = inlined_call_operand.hbm [shape: f32[2,256], index: 2, kind: output, shape index: {}, may-alias: {0,2}]  }
   0x1   :  { %8 = vsyncpa [#allocation4], 0  ;;  %s112_s9 = smov [#allocation2]   ;;  %s64_s13 = scalar_lea.hbm %s157_s0, 64 }
   0x2   :  { %s15_s10 = sshll.u32 %s112_s9, 4  ;;  %p65_p0 = scmp.ne.s32.totalorder %s157_s0, %s64_s13  ;;  %s16_s10 = int_to_ptr.vmem [resolvable:$true] %s15_s10 }
   0x3   :  { %p68_p1 = scmp.lt.u32.totalorder %s64_s13, %s157_s0 }
   0x5   :  { %p70_p2 = pnand %p68_p1, %p65_p0 }
   0x7   :  { %73 = shalt.err (!%p70_p2)
}
   0x8   :  { %s74_s18 = scalar_lea.vmem %s16_s10, 64  ;;  %p79_p4 = scmp.lt.s32.totalorder %s16_s10, %s16_s10 }
   0x9   :  { %p75_p3 = scmp.ne.s32.totalorder %s16_s10, %s74_s18  ;;  %p80_p5 = scmp.lt.s32.totalorder %s74_s18, %s74_s18 }
   0xb   :  { %p81_p6 = por %p80_p5, %p79_p4 }
   0xd   :  { %p82_p7 = pnand %p81_p6, %p75_p3 }
   0xf   :  { %85 = shalt.err (!%p82_p7)
}
  0x10   :  { %18 = dma.hbm_to_vmem [thread:$0]  %s157_s0, 64, %s16_s10, [#allocation3]  }
  0x11   :  { %108 = dma.done.wait [#allocation3], 64  }
  0x12   :  { %109 = vsyncadd [#allocation3], 4294967232  ;;  %v27_v0 = vlaneseq  ;;  %v113_v1 = vmov 1983009808   ;;  %v25_v7 = vld [vmem:[%s158_s1] sm:$0x3] }
  0x13   :  { %v37_v2 = vunpack.c.l.s4 %v113_v1  ;;  %v24_v12 = vld [vmem:[#allocation2] sm:$0xf]  ;;  %s114_s23 = smov [#allocation5]  }
  0x14   :  { %v28_v3 = vshrl.u32 %v27_v0, 7  ;;  %s52_s0 = sshll.u32 %s114_s23, 4  ;;  %s53_s0 = int_to_ptr.vmem [resolvable:$true] %s52_s0 }
  0x15   :  { %v38_v6 = vunpack.c.0.s8 %v37_v2  ;;  %s86_s24 = scalar_lea.vmem %s53_s0, 64  ;;  %p91_p9 = scmp.lt.s32.totalorder %s53_s0, %s53_s0 }
  0x16   :  { %v29_v4 = vsub.s32 0, %v28_v3  ;;  %v33_v5 = vsub.s32 1, %v28_v3  ;;  %p87_p8 = scmp.ne.s32.totalorder %s53_s0, %s86_s24  ;;  %p92_p10 = scmp.lt.s32.totalorder %s86_s24, %s86_s24 }
  0x17   :  { %v41_v10 = vsub.s32 %v38_v6, %v28_v3 }
  0x18   :  { %v30_v8 = vrot.slane %v25_v7, %v29_v4  ;;  %v34_v9 = vrot.slane %v25_v7, %v33_v5  ;;  %p93_p11 = por %p92_p10, %p91_p9 }
  0x1a   :  { %v35_v11 = vcombine.low %v30_v8, %v34_v9  ;;  %p94_p12 = pnand %p93_p11, %p87_p8 }
  0x1c   :  { %v42_v13 = vrot.slane %v35_v11, %v41_v10 }
  0x1e   :  { %v44_v14 = vadd.f32 %v42_v13, %v24_v12 }
  0x20   :  { %45 = vst [vmem:[#allocation5] sm:$0xf] %v44_v14 }
  0x21   :  { %97 = shalt.err (!%p94_p12)
}
  0x22   :  { %s98_s26 = scalar_lea.hbm %s159_s2, 64 }
  0x23   :  { %p99_p13 = scmp.ne.s32.totalorder %s159_s2, %s98_s26  ;;  %p102_p0 = scmp.lt.u32.totalorder %s98_s26, %s159_s2 }
  0x25   :  { %p104_p1 = pnand %p102_p0, %p99_p13 }
  0x27   :  { %107 = shalt.err (!%p104_p1)
}
  0x28   :  { %55 = dma.vmem_to_hbm [thread:$0]  %s53_s0, 64, %s159_s2, [#allocation4]  }
  0x29   :  { %110 = dma.done.wait [#allocation4], 64  }
  0x2a   :  { %111 = vsyncadd [#allocation4], 4294967232 }
  0x2b   :  { %59 = vsyncpa [#allocation3], 1 }
  0x2c   :  { %60 = vsyncpa [#allocation4], 1 }

</bundles_post_ra>
